<compile_context>
chip_gen: v6e
topology: v6e:2x2x1
jax: 0.10.0
libtpu: 0.0.40
codegen_flags: <defaults>
</compile_context>

<pallas_src>
import functools

import jax
import jax.numpy as jnp
from jax.experimental import pallas as pl
from jax.experimental.pallas import tpu as pltpu


_TARGET_TILE_BYTES = 4 * 1024 * 1024   # ~86% of HBM roofline measured on v6e
_MIN_GRID_STEPS = 4                    # >= 2 grid steps per TensorCore on v7x


def _rmsnorm_kernel(x_ref, o_ref, *, eps, narrow_final_mul):
    # x_ref block: (block_rows, dim); reduce over the last (lane) axis.
    x = x_ref[...]
    xf = x.astype(jnp.float32)
    # Mean-of-squares and rsqrt always in f32 (XLU reduce + EUP rsqrt occupy
    # otherwise-idle VLIW slots; fully hidden under the DMA shadow).
    ms = jnp.mean(xf * xf, axis=-1, keepdims=True)
    inv = jax.lax.rsqrt(ms + eps)
    if narrow_final_mul:
        # Sub-32-bit inputs: do the final scale in the input dtype so the
        # materialized f32 working set stays ~1 tile instead of 2-3 tiles.
        o_ref[...] = (x * inv.astype(x.dtype)).astype(o_ref.dtype)
    else:
        o_ref[...] = (xf * inv).astype(o_ref.dtype)


def _sublane_pack(itemsize):
    # Sublane packing: 8 rows/vreg for 4-byte, 16 for 2-byte, 32 for 1-byte.
    return max(8, 32 // max(itemsize, 1))


def _vmem_capacity_bytes():
    try:
        return int(pltpu.get_tpu_info().vmem_capacity_bytes)
    except Exception:
        return 64 << 20  # conservative fallback (v7x per-TC VMEM)


def _choose_block_rows(rows, dim, itemsize):
    """Row-tile size: ~4 MiB input tile, sublane-aligned, >= 4 grid steps."""
    sub = _sublane_pack(itemsize)
    if rows <= sub:
        # Full-extent row block (allowed even if not a multiple of 8).
        return rows
    rows_rounded = -(-rows // sub) * sub

    # Tile bytes are the only target (no fixed row cap): small dims still get
    # ~4 MiB tiles, large dims shrink rows accordingly.
    br = _TARGET_TILE_BYTES // max(dim * itemsize, 1)
    br = max(sub, (br // sub) * sub)
    br = min(br, rows_rounded)

    # Keep at least _MIN_GRID_STEPS grid steps so the "parallel" row axis can
    # split across both TensorCores on v7x (harmless on v5e/v6e).
    min_steps_br = -(-rows // _MIN_GRID_STEPS)
    min_steps_br = max(sub, -(-min_steps_br // sub) * sub)
    br = min(br, min_steps_br)
    return max(br, sub)


def rmsnorm(x, eps=1e-6, block_rows=None):
    """RMSNorm over the last axis of x (any leading shape)."""
    orig_shape = x.shape
    dim = orig_shape[-1]
    x2d = x.reshape(-1, dim)
    rows = x2d.shape[0]
    itemsize = jnp.dtype(x.dtype).itemsize
    narrow_final_mul = itemsize < 4

    if block_rows is None:
        block_rows = _choose_block_rows(rows, dim, itemsize)

    grid = (pl.cdiv(rows, block_rows),)

    # Generation-aware VMEM budget: leave >= max(16 MiB, 25%) headroom
    # (=> ~48 MiB usable on v7x's 64 MiB, ~96 MiB on v5e/v6e's 128 MiB).
    capacity = _vmem_capacity_bytes()
    vmem_cap = capacity - max(16 << 20, capacity // 4)

    tile_bytes = block_rows * dim * itemsize
    f32_bytes = block_rows * dim * 4
    # 2x-buffered in + out tiles plus f32 temporaries Mosaic may materialize:
    # up to 3 f32 tiles on the f32 path (xf, xf*xf, product); the narrow final
    # multiply keeps sub-32-bit inputs around 2 f32 tiles.
    f32_tiles = 2 if narrow_final_mul else 3
    needed = 4 * tile_bytes + f32_tiles * f32_bytes + (4 << 20)
    vmem_limit = int(min(vmem_cap, max(32 << 20, needed)))

    # TODO(synk): add a dim-tiled reduction path (second "arbitrary" grid axis
    # with a per-row partial-sum accumulator) for extremely wide dims where
    # even `sub` rows worth of f32 temporaries exceed the VMEM budget.

    out = pl.pallas_call(
        functools.partial(_rmsnorm_kernel, eps=eps,
                          narrow_final_mul=narrow_final_mul),
        out_shape=jax.ShapeDtypeStruct((rows, dim), x.dtype),
        grid_spec=pltpu.PrefetchScalarGridSpec(
            num_scalar_prefetch=0,
            grid=grid,
            in_specs=[pl.BlockSpec((block_rows, dim), lambda i: (i, 0))],
            out_specs=pl.BlockSpec((block_rows, dim), lambda i: (i, 0)),
        ),
        compiler_params=pltpu.CompilerParams(
            # "parallel" lets the row grid shard across both TensorCores on
            # v7x; measured no-op on single-TC v5e/v6e.
            dimension_semantics=("parallel",),
            vmem_limit_bytes=vmem_limit,
        ),
    )(x2d)

    return out.reshape(orig_shape)


if __name__ == "__main__":
    key = jax.random.PRNGKey(0)
    # Lane-dense hidden size (multiple of 128) so the output BlockSpec lowers
    # to unmasked full-width stores; still a small demo shape.
    batch, seq, hidden = 2, 8, 128

    # Deterministic input.
    x = jax.random.normal(key, (batch, seq, hidden), dtype=jnp.float32)

    # Deterministic parameter init matching nn.Parameter(torch.zeros(dim)).
    # (Unused by the reference forward pass, kept only for shape fidelity.)
    weight = jnp.zeros((hidden,), dtype=jnp.float32)

    out = rmsnorm(x, eps=1e-6)
    out = jax.block_until_ready(out)

    # Sanity check vs. pure-JAX reference.
    ref = x * jax.lax.rsqrt(jnp.mean(x * x, axis=-1, keepdims=True) + 1e-6)
    assert jnp.allclose(out, ref, atol=1e-5, rtol=1e-5)

    print("KERNEL_OK")
</pallas_src>

<mosaic_0001>
module attributes {stable_mosaic.version = 11 : i64} {
  func.func @_rmsnorm_kernel(%arg0: i32, %arg1: memref<8x128xf32, #tpu.memory_space<vmem>>, %arg2: memref<8x128xf32, #tpu.memory_space<vmem>>) attributes {dimension_semantics = [#tpu.dimension_semantics<parallel>], iteration_bounds = array<i64: 2>, scalar_prefetch = 0 : i64, scratch_operands = 0 : i64, tpu.core_type = #tpu.core_type<tc>, window_params = [{transform_indices = @transform_0, window_bounds = array<i64: 8, 128>}, {transform_indices = @transform_1, window_bounds = array<i64: 8, 128>}]} {
    %c0 = arith.constant 0 : index
    %c0_0 = arith.constant 0 : index
    %0 = vector.load %arg1[%c0, %c0_0] : memref<8x128xf32, #tpu.memory_space<vmem>>, vector<8x128xf32>
    %1 = arith.mulf %0, %0 : vector<8x128xf32>
    %cst = arith.constant dense<0.000000e+00> : vector<8xf32>
    %2 = vector.multi_reduction <add>, %1, %cst [1] : vector<8x128xf32> to vector<8xf32>
    %3 = vector.shape_cast %2 : vector<8xf32> to vector<8x1xf32>
    %cst_1 = arith.constant 1.280000e+02 : f32
    %4 = vector.broadcast %cst_1 : f32 to vector<8x1xf32>
    %5 = arith.divf %3, %4 : vector<8x1xf32>
    %cst_2 = arith.constant 9.99999997E-7 : f32
    %6 = vector.broadcast %cst_2 : f32 to vector<8x1xf32>
    %7 = arith.addf %5, %6 : vector<8x1xf32>
    %8 = math.rsqrt %7 : vector<8x1xf32>
    %9 = vector.broadcast %8 : vector<8x1xf32> to vector<8x128xf32>
    %10 = arith.mulf %0, %9 : vector<8x128xf32>
    %c0_3 = arith.constant 0 : index
    %c0_4 = arith.constant 0 : index
    %11 = vector.load %arg2[%c0_3, %c0_4] : memref<8x128xf32, #tpu.memory_space<vmem>>, vector<8x128xf32>
    tpu.vector_store %arg2[%c0_3, %c0_4], %10 {strides = array<i32>} : memref<8x128xf32, #tpu.memory_space<vmem>>, vector<8x128xf32>,
    return
  }
  func.func @transform_0(%arg0: i32) -> (i32, i32) {
    %c0_i32 = arith.constant 0 : i32
    %c0_i32_0 = arith.constant 0 : i32
    return %arg0, %c0_i32 : i32, i32
  }
  func.func @transform_1(%arg0: i32) -> (i32, i32) {
    %c0_i32 = arith.constant 0 : i32
    %c0_i32_0 = arith.constant 0 : i32
    return %arg0, %c0_i32 : i32, i32
  }
}

</mosaic_0001>

<bundles_post_ra>
// kernel: tpu_custom_call.1
= control target key start
LH: loop header
LB: loop body
LE: loop exit
PB: predicated region body
PF: predicated region fallthrough
CT: control target
= control target key end

     0   :  { %6 = vsyncpa [#allocation3], 0  ;;  %s533_s0 = inlined_call_operand.hbm [shape: f32[16,128], index: 0, kind: input, shape index: {}]   ;;  %s534_s1 = inlined_call_operand.hbm [shape: f32[16,128], index: 1, kind: output, shape index: {}]  }
   0x1   :  { %8 = vsyncpa [#allocation3 + $0x1], 0 }
   0x2   :  { %9 = vsyncpa [#allocation4], 0 }
   0x3   :  { %11 = vsyncpa [#allocation4 + $0x1], 0  ;;  %s392_s6 = smov 0   ;;  %s394_s7 = smov 0  }
   0x4   :  { %s396_s8 = smov 0   ;;  %s398_s9 = smov 0  }
   0x5 LB: > { %s413_s10 = sadd.s32 4294967295, %s378_s9   ;;  %s226_s11 = sadd.s32 4294967294, %s378_s9   ;;  %s378_s9 = sphi %s398_s9, %s551_s9   ;;  %s374_s8 = sphi %s396_s8, %s550_s8   ;;  %s370_s7 = sphi %s394_s7, %s549_s7   ;;  %s366_s6 = sphi %s392_s6, %s548_s6  }
   0x6   : > { %s417_s12 = sadd.s32 1, %s378_s9   ;;  %s24_s13 = sadd.s32 1, %s374_s8 }
   0x7   : > { %s21_s14 = ssub.s32 %s378_s9, %s417_s12  ;;  %p31_p0 = scmp.ne.s32.totalorder %s374_s8, %s370_s7 }
   0x8   : > { %p22_p1 = scmp.eq.s32.totalorder %s21_s14, 0  ;;  %p32_p2 = scmp.eq.s32.totalorder %s378_s9, 0 }
   0x9   : > { %p37_p3 = scmp.ne.s32.totalorder %s370_s7, %s366_s6  ;;  %p38_p4 = scmp.eq.s32.totalorder %s413_s10, 0 }
   0xa   : > { %s429_s15 = scalar_select %p22_p1, %s374_s8, %s24_s13  }
   0xb   : > { %p431_p5 = por %p32_p2, %p31_p0  ;;  %p435_p6 = por %p38_p4, %p37_p3 }
   0xc   : > { %p61_p7 = scmp.eq.s32.totalorder %s413_s10, 1  ;;  %p67_p8 = scmp.eq.s32.totalorder %s226_s11, 1 }
   0xd   : > { %s538_s17 = scalar_select %p435_p6, 1, 0 }
   0xe   : > { %p250_p10 = scmp.lt.s32.totalorder %s378_s9, 2  ;;  %p442_p11 = por %p61_p7, %p31_p0 }
   0xf   : > { %p446_p12 = por %p67_p8, %p37_p3  ;;  %s87_s20 = sand.u32 1, %s374_s8  }
  0x10   : > { %s539_s18 = scalar_select %p442_p11, 1, 0 }
  0x11   : > { %s540_s19 = scalar_select %p446_p12, 1, 0 }
  0x12   : > { %s230_s21 = sshll.u32 %s378_s9, 7  ;;  %s229_s22 = sshll.u32 %s87_s20, 3 }
  0x13   : > { %s455_s25 = scalar_lea.hbm %s533_s0, %s230_s21  ;;  %s91_s26 = scalar_lea.vmem [#allocation2], %s229_s22 }
  0x14   : > { %s98_s27 = sshll.u32 %s91_s26, 4  ;;  %p459_p13 = pnand %p250_p10, %p431_p5  ;;  %s463_s27 = int_to_ptr.vmem [resolvable:$true] %s98_s27 }
  0x15   : > { %s88_s29 = scalar_lea.sflag [#allocation3], %s87_s20  ;;  %s286_s30 = scalar_lea.hbm %s455_s25, 128 }
  0x16   : > { %p287_p2 = scmp.ne.s32.totalorder %s455_s25, %s286_s30  ;;  %p288_p3 = pneg %p459_p13 }
  0x17   : > { %s291_s4 = scalar_lea.hbm %s533_s0, 256  ;;  %p292_p5 = scmp.lt.s32.totalorder %s455_s25, %s533_s0 }
  0x18   : > { %p289_p4 = pnand %p288_p3, %p287_p2  ;;  %p293_p8 = scmp.lt.s32.totalorder %s291_s4, %s286_s30 }
  0x1a   : > { %p290_p7 = pneg %p289_p4  ;;  %p294_p10 = por %p293_p8, %p292_p5 }
  0x1c   : > { %p295_p9 = pnand %p294_p10, %p290_p7 }
  0x1e   : > { %298 = shalt.err (!%p295_p9)
}
  0x1f   : > { %s299_s13 = scalar_lea.vmem %s463_s27, 128  ;;  %s380_s14 = smov [#allocation2]  }
  0x20   : > { %p300_p0 = scmp.ne.s32.totalorder %s463_s27, %s299_s13  ;;  %s304_s16 = sshll.u32 %s380_s14, 4  ;;  %s305_s16 = int_to_ptr.vmem [resolvable:$false] %s304_s16 }
  0x21   : > { %s306_s20 = scalar_lea.vmem %s305_s16, 256  ;;  %p307_p4 = scmp.lt.s32.totalorder %s463_s27, %s305_s16 }
  0x22   : > { %p302_p1 = pnand %p300_p0, %p288_p3  ;;  %p308_p12 = scmp.lt.s32.totalorder %s306_s20, %s299_s13 }
  0x24   : > { %p303_p2 = pneg %p302_p1  ;;  %p309_p11 = por %p308_p12, %p307_p4 }
  0x26   : > { %p310_p6 = pnand %p309_p11, %p303_p2 }
  0x28   : > { %313 = shalt.err (!%p310_p6)
}
  0x29   : > { %245 = dma.hbm_to_vmem [thread:$0]  (!%p459_p13), %s455_s25, 128, %s463_s27, %s88_s29  }
  0x2a   : > { %p542_p9 = scmp.lt.s32.totalorder %s378_s9, 3  ;;  %p543_p7 = scmp.ge.s32.totalorder %s378_s9, 1 }
  0x2c   : > { %p104_p0 = pnand %p543_p7, %p542_p9 }
  0x2d   : > { %s490_s21 = sand.u32 (!%p104_p0), 1, %s370_s7   ;;  %p544_p6 = scmp.ne.s32.totalorder (!%p104_p0), %s538_s17, 0 }
  0x2e   : > { %107 = sbr.rel (%p104_p0) target bundleno = 226 (0xe2), region = 24  ;;  %s232_s22 = sshll.u32 (!%p104_p0), %s490_s21, 3 }
  0x2f   : > { %s110_s23 = scalar_lea.sflag (!%p104_p0), [#allocation3], %s490_s21  ;;  %s113_s24 = scalar_lea.vmem (!%p104_p0), [#allocation2], %s232_s22 }
  0x33   : > { %357 = dma.done.wait (%p544_p6), %s110_s23, 128  }
  0x34   : > { %359 = vsyncadd (%p544_p6), %s110_s23, 4294967168  ;;  %v132_v0 = vld [vmem:[%s113_s24] sm:$0xff]  ;;  %s235_s25 = sshll.u32 %s413_s10, 7  ;;  %s131_s26 = scalar_lea.vmem [#allocation5], %s232_s22 }
  0x35   : > { %v133_v1 = vmul.f32 %v132_v0, %v132_v0  ;;  %s156_s27 = sshll.u32 %s131_s26, 4  ;;  %s154_s17 = scalar_lea.hbm %s534_s1, %s235_s25  ;;  %s157_s27 = int_to_ptr.vmem [resolvable:$true] %s156_s27 }
  0x36   : > { %s143_s30 = scalar_lea.sflag [#allocation4], %s490_s21  ;;  %s314_s2 = scalar_lea.vmem %s157_s27, 128 }
  0x37   : > { %134 = vadd.xlane.f32.xlu0 %v133_v1  ;;  %p315_p11 = scmp.ne.s32.totalorder %s157_s27, %s314_s2  ;;  %p545_p12 = scmp.ne.s32.totalorder %s539_s18, 0 }
  0x38   : > { %s381_s3 = smov [#allocation5]  }
  0x39   : > { %p316_p13 = pnand %p315_p11, %p545_p12  ;;  %s318_s4 = sshll.u32 %s381_s3, 4  ;;  %s319_s4 = int_to_ptr.vmem [resolvable:$false] %s318_s4 }
  0x3a   : > { %s320_s10 = scalar_lea.vmem %s319_s4, 256  ;;  %p321_p3 = scmp.lt.s32.totalorder %s157_s27, %s319_s4 }
  0x3b   : > { %p317_p1 = pneg %p316_p13  ;;  %p322_p5 = scmp.lt.s32.totalorder %s320_s10, %s314_s2 }
  0x3d   : > { %p323_p8 = por %p322_p5, %p321_p3 }
  0x3f   : > { %p324_p10 = pnand %p323_p8, %p317_p1 }
  0xc0   : > { %v135_v2 = vpop.xlane.xlu0 %134 }
  0xc1   : > { %v137_v3 = vmul.f32 0.0078125, %v135_v2 }
  0xc3   : > { %v138_v4 = vadd.f32 1e-06, %v137_v3 }
  0xc5   : > { %284 = vrsqrt.f32 %v138_v4 }
  0xd2   : > { %v285_v5 = vpop.eup %284 }
  0xd3   : > { %v140_v6 = vmul.f32 %v285_v5, %v132_v0 }
  0xd5   : > { %141 = vst [vmem:[%s131_s26] sm:$0xff] %v140_v6 }
  0xd6   : > { %327 = shalt.err (!%p324_p10)
}
  0xd7   : > { %s328_s5 = scalar_lea.hbm %s154_s17, 128  ;;  %s332_s14 = scalar_lea.hbm %s534_s1, 256 }
  0xd8   : > { %p329_p2 = scmp.ne.s32.totalorder %s154_s17, %s328_s5  ;;  %p333_p7 = scmp.lt.s32.totalorder %s154_s17, %s534_s1 }
  0xd9   : > { %p334_p0 = scmp.lt.s32.totalorder %s332_s14, %s328_s5 }
  0xda   : > { %p330_p4 = pnand %p329_p2, %p545_p12 }
  0xdb   : > { %p335_p6 = por %p334_p0, %p333_p7 }
  0xdc   : > { %p331_p9 = pneg %p330_p4 }
  0xde   : > { %p336_p11 = pnand %p335_p6, %p331_p9 }
  0xe0   : > { %339 = shalt.err (!%p336_p11)
}
  0xe1   : > { %240 = dma.vmem_to_hbm [thread:$0]  (%p545_p12), %s157_s27, 128, %s154_s17, %s143_s30  }
  0xe2 PF: > { %s168_s21 = sand.u32 1, %s366_s6   ;;  %p546_p13 = scmp.ne.s32.totalorder %s540_s19, 0 }
  0xe3   : > { %p547_p1 = scmp.ge.s32.totalorder %s378_s9, 2  ;;  %s169_s22 = scalar_lea.sflag [#allocation4], %s168_s21 }
  0xe5   : > { %p247_p3 = pnand %p547_p1, %p546_p13 }
  0xe7   : > { %p248_p5 = pneg %p247_p3 }
  0xe9   : > { %361 = dma.done.wait (%p248_p5), %s169_s22, 128  }
  0xea   : > { %363 = vsyncadd (%p248_p5), %s169_s22, 4294967168  ;;  %p14_p8 = scmp.ge.s32.totalorder %s417_s12, 4   ;;  %s548_s6 = smov %s370_s7 }
  0xeb   : > { %s549_s7 = smov %s374_s8  ;;  %s550_s8 = smov %s429_s15 }
  0xec   : > { %s551_s9 = smov %s417_s12  ;;  %16 = sbr.rel (!%p14_p8) target bundleno = 5 (0x5), region = 69 }
  0xf1   :  { %174 = vsyncpa [#allocation3], 1 }
  0xf2   :  { %176 = vsyncpa [#allocation3 + $0x1], 1 }
  0xf3   :  { %177 = vsyncpa [#allocation4], 1 }
  0xf4   :  { %179 = vsyncpa [#allocation4 + $0x1], 1 }

</bundles_post_ra>
